<compile_context>
chip_gen: v6e
topology: v6e:2x2x1
jax: 0.10.0
libtpu: 0.0.40
codegen_flags: <defaults>
</compile_context>

<pallas_src>
import functools

import numpy as np
import jax
import jax.numpy as jnp
from jax import lax
from jax.experimental import pallas as pl
from jax.experimental.pallas import tpu as pltpu


def _sobelxy_kernel(mask_ref, x_ref, o_ref, *, width, npad):
    """One grid step: TB flattened images, each a lane-dense row of N_pad elems.

    mask_ref: (8, N_pad) f32 multiplicative boundary masks
      row 0: m_top (0 where the row above is zero padding, i.e. pos <  W)
      row 1: m_bot (0 where the row below is zero padding, i.e. pos >= H*W - W)
      row 2: m_l   (0 where the left  neighbour is padding, i.e. col == 0)
      row 3: m_r   (0 where the right neighbour is padding, i.e. col == W - 1)
      rows 4-7: sublane padding (zeros). All rows are 0 on lane-pad positions.
    """
    x = x_ref[...].astype(jnp.float32)
    w = width
    n = npad

    m_top = mask_ref[0:1, :]
    m_bot = mask_ref[1:2, :]
    m_l = mask_ref[2:3, :]
    m_r = mask_ref[3:4, :]

    # pltpu.roll follows jnp.roll semantics: out[f] = in[(f - shift) % n].
    top = pltpu.roll(x, shift=w % n, axis=1) * m_top          # x[i-1, j]
    bot = pltpu.roll(x, shift=(n - w) % n, axis=1) * m_bot    # x[i+1, j]

    # ---- Gx branch first (lower peak liveness of block-sized temps) ----
    # S(i,j) = x[i-1,j] + 2*x[i,j] + x[i+1,j];  Gx = S(i,j+1) - S(i,j-1)
    s = top + 2.0 * x + bot
    gx = (pltpu.roll(s, shift=(n - 1) % n, axis=1) * m_r      # S(i, j+1)
          - pltpu.roll(s, shift=1 % n, axis=1) * m_l)         # S(i, j-1)
    out = jnp.abs(gx)

    # ---- Gy branch ----
    # D(i,j) = x[i-1,j] - x[i+1,j];  Gy = D(i,j-1) + 2*D(i,j) + D(i,j+1)
    d = top - bot
    gy = (pltpu.roll(d, shift=1 % n, axis=1) * m_l            # D(i, j-1)
          + 2.0 * d
          + pltpu.roll(d, shift=(n - 1) % n, axis=1) * m_r)   # D(i, j+1)

    o_ref[...] = (out + jnp.abs(gy)).astype(o_ref.dtype)


def _vmem_capacity_bytes():
    """Best-effort VMEM capacity query; conservative (v7x) fallback."""
    try:
        info = pltpu.get_tpu_info()
        cap = getattr(info, "vmem_capacity_bytes", None)
        if cap:
            return int(cap)
    except Exception:
        pass
    return 64 * 2**20


def sobelxy(x, *, target_grid_steps=8):
    """x: (B, 1, H, W) -> (B, 1, H, W), matching the torch Sobelxy.forward."""
    B, C, H, W = x.shape
    if C != 1:
        raise ValueError("Sobelxy weights have in_channels == 1")
    N = H * W
    itemsize = int(jnp.dtype(x.dtype).itemsize)

    # Lane-dense flatten (free reshape). Pad the lane axis to a multiple of 128
    # so stores are unmasked full-lane vst; pad tiny batches up to one full
    # sublane pack (8 rows for f32) so vregs are sublane-dense.
    N_pad = ((N + 127) // 128) * 128
    B_pad = 8 if B < 8 else B          # large B: last partial block is masked by Pallas
    xf = x.reshape(B, N)
    if B_pad != B or N_pad != N:
        xf = jnp.pad(xf, ((0, B_pad - B), (0, N_pad - N)))

    # Precomputed multiplicative boundary masks (trace-time numpy; no in-kernel
    # iota / where / mod). Zero on lane-padding positions.
    pos = np.arange(N_pad, dtype=np.int64)
    col = pos % W
    valid = pos < N
    masks_np = np.zeros((8, N_pad), dtype=np.float32)
    masks_np[0] = ((pos >= W) & valid).astype(np.float32)        # top neighbour in-bounds
    masks_np[1] = ((pos < N - W) & valid).astype(np.float32)     # bottom neighbour in-bounds
    masks_np[2] = ((col != 0) & valid).astype(np.float32)        # left neighbour in-bounds
    masks_np[3] = ((col != W - 1) & valid).astype(np.float32)    # right neighbour in-bounds
    masks = jnp.asarray(masks_np)

    # ---- batch-tile selection -------------------------------------------
    vmem_cap = _vmem_capacity_bytes()
    # Per image-row VMEM footprint: double-buffered in+out blocks plus the
    # roll-materialized f32 temporaries (~8 block-sized live arrays, upper bound).
    per_row = 4 * N_pad * itemsize + 8 * N_pad * 4
    budget = max(2 * 2**20, vmem_cap // 6)
    max_tb_vmem = max(8, budget // per_row)

    # Keep several grid steps for double-buffered DMA overlap and so the
    # single "parallel" axis can shard across v7x's two TensorCores.
    target_steps = max(1, min(target_grid_steps, B_pad // 8))
    tb = min(max_tb_vmem, pl.cdiv(B_pad, target_steps))
    tb = max(8, (tb // 8) * 8)          # multiple of the f32 sublane pack
    tb = min(tb, B_pad)
    grid = (pl.cdiv(B_pad, tb),)

    # Explicit VMEM budget: double-buffered I/O + f32 temporaries + masks.
    vmem_limit = int(min(vmem_cap,
                         max(16 * 2**20,
                             4 * tb * N_pad * itemsize
                             + 8 * tb * N_pad * 4
                             + 2 * 8 * N_pad * 4
                             + (1 << 20))))

    cost = pl.CostEstimate(
        flops=18 * B_pad * N_pad,
        transcendentals=0,
        bytes_accessed=2 * B_pad * N_pad * itemsize + 8 * N_pad * 4,
    )

    out = pl.pallas_call(
        functools.partial(_sobelxy_kernel, width=W, npad=N_pad),
        out_shape=jax.ShapeDtypeStruct((B_pad, N_pad), x.dtype),
        grid_spec=pltpu.PrefetchScalarGridSpec(
            num_scalar_prefetch=0,
            grid=grid,
            in_specs=[
                pl.BlockSpec((8, N_pad), lambda b: (0, 0)),    # boundary masks
                pl.BlockSpec((tb, N_pad), lambda b: (b, 0)),   # flattened images
            ],
            out_specs=pl.BlockSpec((tb, N_pad), lambda b: (b, 0)),
        ),
        compiler_params=pltpu.CompilerParams(
            dimension_semantics=("parallel",),
            vmem_limit_bytes=vmem_limit,
        ),
        cost_estimate=cost,
    )(masks, xf)

    if B_pad != B or N_pad != N:
        out = out[:B, :N]
    return out.reshape(B, 1, H, W)


def _sobelxy_ref(x):
    """Pure-JAX reference using lax.conv (mirrors F.conv2d semantics)."""
    kx = jnp.array([[-1., 0., 1.], [-2., 0., 2.], [-1., 0., 1.]],
                   dtype=x.dtype)[None, None]
    ky = jnp.array([[1., 2., 1.], [0., 0., 0.], [-1., -2., -1.]],
                   dtype=x.dtype)[None, None]
    dn = lax.conv_dimension_numbers(x.shape, kx.shape, ("NCHW", "OIHW", "NCHW"))
    gx = lax.conv_general_dilated(x, kx, (1, 1), ((1, 1), (1, 1)),
                                  dimension_numbers=dn)
    gy = lax.conv_general_dilated(x, ky, (1, 1), ((1, 1), (1, 1)),
                                  dimension_numbers=dn)
    return jnp.abs(gx) + jnp.abs(gy)


if __name__ == "__main__":
    key = jax.random.PRNGKey(0)
    x = jax.random.normal(key, (2, 1, 16, 16), dtype=jnp.float32)

    out = jax.block_until_ready(sobelxy(x))
    ref = jax.block_until_ready(_sobelxy_ref(x))

    assert out.shape == (2, 1, 16, 16)
    assert jnp.allclose(out, ref, atol=1e-5, rtol=1e-5)
    print("KERNEL_OK")
</pallas_src>

<mosaic_0001>
module attributes {stable_mosaic.version = 11 : i64} {
  func.func @_sobelxy_kernel(%arg0: i32, %arg1: memref<8x256xf32, #tpu.memory_space<vmem>>, %arg2: memref<8x256xf32, #tpu.memory_space<vmem>>, %arg3: memref<8x256xf32, #tpu.memory_space<vmem>>) attributes {dimension_semantics = [#tpu.dimension_semantics<parallel>], iteration_bounds = array<i64: 1>, scalar_prefetch = 0 : i64, scratch_operands = 0 : i64, tpu.core_type = #tpu.core_type<tc>, window_params = [{pipeline_mode = #tpu.pipeline_mode<synchronous>, transform_indices = @transform_0, window_bounds = array<i64: 8, 256>}, {transform_indices = @transform_1, window_bounds = array<i64: 8, 256>}, {transform_indices = @transform_2, window_bounds = array<i64: 8, 256>}]} {
    %c0 = arith.constant 0 : index
    %c0_0 = arith.constant 0 : index
    %0 = vector.load %arg2[%c0, %c0_0] : memref<8x256xf32, #tpu.memory_space<vmem>>, vector<8x256xf32>
    %c0_1 = arith.constant 0 : index
    %c0_2 = arith.constant 0 : index
    %1 = vector.load %arg1[%c0_1, %c0_2] : memref<8x256xf32, #tpu.memory_space<vmem>>, vector<1x256xf32>
    %c1 = arith.constant 1 : index
    %c0_3 = arith.constant 0 : index
    %2 = vector.load %arg1[%c1, %c0_3] : memref<8x256xf32, #tpu.memory_space<vmem>>, vector<1x256xf32>
    %c2 = arith.constant 2 : index
    %c0_4 = arith.constant 0 : index
    %3 = vector.load %arg1[%c2, %c0_4] : memref<8x256xf32, #tpu.memory_space<vmem>>, vector<1x256xf32>
    %c3 = arith.constant 3 : index
    %c0_5 = arith.constant 0 : index
    %4 = vector.load %arg1[%c3, %c0_5] : memref<8x256xf32, #tpu.memory_space<vmem>>, vector<1x256xf32>
    %c16_i32 = arith.constant 16 : i32
    %5 = tpu.dynamic_rotate %0 by %c16_i32 dim 1 : vector<8x256xf32>, i32 -> vector<8x256xf32>
    %6 = vector.broadcast %1 : vector<1x256xf32> to vector<8x256xf32>
    %7 = arith.mulf %5, %6 : vector<8x256xf32>
    %c240_i32 = arith.constant 240 : i32
    %8 = tpu.dynamic_rotate %0 by %c240_i32 dim 1 : vector<8x256xf32>, i32 -> vector<8x256xf32>
    %9 = vector.broadcast %2 : vector<1x256xf32> to vector<8x256xf32>
    %10 = arith.mulf %8, %9 : vector<8x256xf32>
    %cst = arith.constant 2.000000e+00 : f32
    %11 = vector.broadcast %cst : f32 to vector<8x256xf32>
    %12 = arith.mulf %11, %0 : vector<8x256xf32>
    %13 = arith.addf %7, %12 : vector<8x256xf32>
    %14 = arith.addf %13, %10 : vector<8x256xf32>
    %c255_i32 = arith.constant 255 : i32
    %15 = tpu.dynamic_rotate %14 by %c255_i32 dim 1 : vector<8x256xf32>, i32 -> vector<8x256xf32>
    %16 = vector.broadcast %4 : vector<1x256xf32> to vector<8x256xf32>
    %17 = arith.mulf %15, %16 : vector<8x256xf32>
    %c1_i32 = arith.constant 1 : i32
    %18 = tpu.dynamic_rotate %14 by %c1_i32 dim 1 : vector<8x256xf32>, i32 -> vector<8x256xf32>
    %19 = vector.broadcast %3 : vector<1x256xf32> to vector<8x256xf32>
    %20 = arith.mulf %18, %19 : vector<8x256xf32>
    %21 = arith.subf %17, %20 : vector<8x256xf32>
    %22 = math.absf %21 : vector<8x256xf32>
    %23 = arith.subf %7, %10 : vector<8x256xf32>
    %c1_i32_6 = arith.constant 1 : i32
    %24 = tpu.dynamic_rotate %23 by %c1_i32_6 dim 1 : vector<8x256xf32>, i32 -> vector<8x256xf32>
    %25 = vector.broadcast %3 : vector<1x256xf32> to vector<8x256xf32>
    %26 = arith.mulf %24, %25 : vector<8x256xf32>
    %cst_7 = arith.constant 2.000000e+00 : f32
    %27 = vector.broadcast %cst_7 : f32 to vector<8x256xf32>
    %28 = arith.mulf %27, %23 : vector<8x256xf32>
    %29 = arith.addf %26, %28 : vector<8x256xf32>
    %c255_i32_8 = arith.constant 255 : i32
    %30 = tpu.dynamic_rotate %23 by %c255_i32_8 dim 1 : vector<8x256xf32>, i32 -> vector<8x256xf32>
    %31 = vector.broadcast %4 : vector<1x256xf32> to vector<8x256xf32>
    %32 = arith.mulf %30, %31 : vector<8x256xf32>
    %33 = arith.addf %29, %32 : vector<8x256xf32>
    %34 = math.absf %33 : vector<8x256xf32>
    %35 = arith.addf %22, %34 : vector<8x256xf32>
    %c0_9 = arith.constant 0 : index
    %c0_10 = arith.constant 0 : index
    %36 = vector.load %arg3[%c0_9, %c0_10] : memref<8x256xf32, #tpu.memory_space<vmem>>, vector<8x256xf32>
    tpu.vector_store %arg3[%c0_9, %c0_10], %35 {strides = array<i32>} : memref<8x256xf32, #tpu.memory_space<vmem>>, vector<8x256xf32>,
    return
  }
  func.func @transform_0(%arg0: i32) -> (i32, i32) {
    %c0_i32 = arith.constant 0 : i32
    %c0_i32_0 = arith.constant 0 : i32
    %c0_i32_1 = arith.constant 0 : i32
    return %c0_i32, %c0_i32_0 : i32, i32
  }
  func.func @transform_1(%arg0: i32) -> (i32, i32) {
    %c0_i32 = arith.constant 0 : i32
    %c0_i32_0 = arith.constant 0 : i32
    return %arg0, %c0_i32 : i32, i32
  }
  func.func @transform_2(%arg0: i32) -> (i32, i32) {
    %c0_i32 = arith.constant 0 : i32
    %c0_i32_0 = arith.constant 0 : i32
    return %arg0, %c0_i32 : i32, i32
  }
}

</mosaic_0001>

<bundles_post_ra>
// kernel: tpu_custom_call.1
= control target key start
LH: loop header
LB: loop body
LE: loop exit
PB: predicated region body
PF: predicated region fallthrough
CT: control target
= control target key end

     0   :  { %7 = vsyncpa [#allocation3], 0  ;;  %s309_s0 = inlined_call_operand.hbm [shape: f32[8,256], index: 0, kind: input, shape index: {}]   ;;  %s310_s1 = inlined_call_operand.hbm [shape: f32[8,256], index: 1, kind: input, shape index: {}]   ;;  %s311_s2 = inlined_call_operand.hbm [shape: f32[8,256], index: 2, kind: output, shape index: {}]  }
   0x1   :  { %8 = vsyncpa [#allocation6], 0 }
   0x2   :  { %9 = vsyncpa [#allocation4], 0  ;;  %s256_s9 = smov [#allocation2]   ;;  %s257_s11 = smov [#allocation5]  }
   0x3   :  { %s16_s10 = sshll.u32 %s256_s9, 4  ;;  %s26_s12 = sshll.u32 %s257_s11, 4  ;;  %s17_s10 = int_to_ptr.vmem [resolvable:$true] %s16_s10  ;;  %s27_s12 = int_to_ptr.vmem [resolvable:$true] %s26_s12 }
   0x4   :  { %s198_s13 = scalar_lea.vmem %s17_s10, 256  ;;  %p203_p1 = scmp.lt.s32.totalorder %s17_s10, %s17_s10 }
   0x5   :  { %p199_p0 = scmp.ne.s32.totalorder %s17_s10, %s198_s13  ;;  %p204_p2 = scmp.lt.s32.totalorder %s198_s13, %s198_s13 }
   0x7   :  { %p205_p3 = por %p204_p2, %p203_p1 }
   0x9   :  { %p206_p4 = pnand %p205_p3, %p199_p0 }
   0xb   :  { %209 = shalt.err (!%p206_p4)
}
   0xc   :  { %19 = dma.hbm_to_vmem [thread:$0]  %s309_s0, 256, %s17_s10, [#allocation3]  }
   0xd   :  { %s218_s16 = scalar_lea.vmem %s27_s12, 256  ;;  %p223_p6 = scmp.lt.s32.totalorder %s27_s12, %s27_s12 }
   0xe   :  { %p219_p5 = scmp.ne.s32.totalorder %s27_s12, %s218_s16  ;;  %p224_p7 = scmp.lt.s32.totalorder %s218_s16, %s218_s16 }
  0x10   :  { %p225_p8 = por %p224_p7, %p223_p6 }
  0x12   :  { %p226_p9 = pnand %p225_p8, %p219_p5 }
  0x14   :  { %229 = shalt.err (!%p226_p9)
}
  0x15   :  { %29 = dma.hbm_to_vmem [thread:$0]  %s310_s1, 256, %s27_s12, [#allocation6]  }
  0x16   :  { %250 = dma.done.wait [#allocation3], 256  }
  0x17   :  { %251 = vsyncadd [#allocation3], 4294967040 }
  0x18   :  { %252 = dma.done.wait [#allocation6], 256  }
  0x19   :  { %253 = vsyncadd [#allocation6], 4294967040  ;;  %v36_v0 = vld [vmem:[#allocation5] sm:$0xff]  ;;  %s258_s19 = smov 112   ;;  %s259_s20 = smov 16   ;;  %v37_v1 = vld [vmem:[#allocation5 + $0x8] sm:$0xff]  ;;  %v49_v2 = vlaneseq }
  0x1a   :  { %67 = vrot.lane.b32.xlu1 %v36_v0, %s258_s19  ;;  %45 = vrot.lane.b32.xlu0 %v36_v0, %s259_s20  ;;  %v40_v7 = vld [vmem:[#allocation2 + $0x1] ss:$8 sm:$0x3]  ;;  %v38_v8 = vld [vmem:[#allocation2] ss:$8 sm:$0x3] }
  0x1b   :  { %v56_v3 = vshrl.u32 %v49_v2, 7  ;;  %v284_v4 = vand.u32 127, %v49_v2  ;;  %v87_v15 = vmul.f32 2.0, %v36_v0  ;;  %v88_v16 = vmul.f32 2.0, %v37_v1  ;;  %s260_s0 = smov 1   ;;  %s261_s1 = smov 127  }
  0x1c   :  { %v42_v35 = vld [vmem:[#allocation2 + $0x2] ss:$8 sm:$0x3]  ;;  %v44_v37 = vld [vmem:[#allocation2 + $0x3] ss:$8 sm:$0x3] }
  0x1d   :  { %v57_v5 = vsub.s32 0, %v56_v3  ;;  %v61_v6 = vsub.s32 1, %v56_v3  ;;  %vm71_vm0 = vcmp.lt.s32.totalorder %v284_v4, 112  ;;  %vm51_vm1 = vcmp.lt.s32.totalorder %v284_v4, 16  ;;  %s262_s21 = smov [#allocation7]  }
  0x1e   :  { %69 = vrot.lane.b32.xlu1 %v37_v1, %s258_s19  ;;  %47 = vrot.lane.b32.xlu0 %v37_v1, %s259_s20  ;;  %vm117_vm2 = vcmp.lt.s32.totalorder %v284_v4, 1  ;;  %vm97_vm3 = vcmp.lt.s32.totalorder %v284_v4, 127  ;;  %s173_s22 = sshll.u32 %s262_s21, 4  ;;  %s174_s22 = int_to_ptr.vmem [resolvable:$true] %s173_s22 }
  0x1f   :  { %v78_v11 = vrot.slane %v40_v7, %v57_v5  ;;  %v82_v12 = vrot.slane %v40_v7, %v61_v6  ;;  %v58_v13 = vrot.slane %v38_v8, %v57_v5  ;;  %v62_v14 = vrot.slane %v38_v8, %v61_v6  ;;  %s230_s23 = scalar_lea.vmem %s174_s22, 256  ;;  %p235_p11 = scmp.lt.s32.totalorder %s174_s22, %s174_s22 }
  0x20   :  { %v124_v39 = vrot.slane %v42_v35, %v57_v5  ;;  %v128_v40 = vrot.slane %v42_v35, %v61_v6  ;;  %v104_v43 = vrot.slane %v44_v37, %v57_v5  ;;  %v108_v44 = vrot.slane %v44_v37, %v61_v6  ;;  %p231_p10 = scmp.ne.s32.totalorder %s174_s22, %s230_s23  ;;  %p236_p12 = scmp.lt.s32.totalorder %s230_s23, %s230_s23 }
  0x22   :  { %p237_p13 = por %p236_p12, %p235_p11 }
  0x24   :  { %p238_p0 = pnand %p237_p13, %p231_p10 }
  0x8c   :  { %v68_v9 = vpop.permute.xlu1 %67  ;;  %v46_v10 = vpop.permute.xlu0 %45 }
  0x90   :  { %v70_v17 = vpop.permute.xlu1 %69  ;;  %v48_v18 = vpop.permute.xlu0 %47 }
  0x91   :  { %v72_v19 = vsel %vm71_vm0, %v68_v9, %v70_v17  ;;  %v73_v20 = vsel %vm71_vm0, %v70_v17, %v68_v9  ;;  %v52_v21 = vsel %vm51_vm1, %v46_v10, %v48_v18  ;;  %v53_v22 = vsel %vm51_vm1, %v48_v18, %v46_v10 }
  0x92   :  { %v85_v23 = vmul.f32 %v78_v11, %v72_v19  ;;  %v86_v24 = vmul.f32 %v82_v12, %v73_v20  ;;  %v65_v25 = vmul.f32 %v58_v13, %v53_v22  ;;  %v66_v26 = vmul.f32 %v62_v14, %v52_v21 }
  0x94   :  { %v89_v27 = vadd.f32 %v87_v15, %v65_v25  ;;  %v90_v28 = vadd.f32 %v88_v16, %v66_v26  ;;  %v137_v29 = vsub.f32 %v65_v25, %v85_v23  ;;  %v138_v30 = vsub.f32 %v66_v26, %v86_v24 }
  0x96   :  { %139 = vrot.lane.b32.xlu0 %v137_v29, %s260_s0  ;;  %141 = vrot.lane.b32.xlu1 %v138_v30, %s260_s0  ;;  %v92_v31 = vadd.f32 %v90_v28, %v86_v24  ;;  %v91_v32 = vadd.f32 %v89_v27, %v85_v23  ;;  %v147_v55 = vmul.f32 2.0, %v137_v29  ;;  %v148_v57 = vmul.f32 2.0, %v138_v30 }
  0x9a   :  { %95 = vrot.lane.b32.xlu1 %v92_v31, %s261_s1  ;;  %93 = vrot.lane.b32.xlu0 %v91_v32, %s261_s1 }
  0x9e   :  { %115 = vrot.lane.b32.xlu1 %v92_v31, %s260_s0  ;;  %113 = vrot.lane.b32.xlu0 %v91_v32, %s260_s0 }
  0xa2   :  { %153 = vrot.lane.b32.xlu1 %v138_v30, %s261_s1  ;;  %151 = vrot.lane.b32.xlu0 %v137_v29, %s261_s1 }
 0x108   :  { %v140_v33 = vpop.permute.xlu0 %139  ;;  %v142_v34 = vpop.permute.xlu1 %141 }
 0x109   :  { %v144_v41 = vsel %vm117_vm2, %v142_v34, %v140_v33  ;;  %v143_v42 = vsel %vm117_vm2, %v140_v33, %v142_v34 }
 0x10a   :  { %v145_v48 = vmul.f32 %v144_v41, %v124_v39  ;;  %v146_v52 = vmul.f32 %v143_v42, %v128_v40 }
 0x10c   :  { %v96_v36 = vpop.permute.xlu1 %95  ;;  %v94_v38 = vpop.permute.xlu0 %93  ;;  %v149_v61 = vadd.f32 %v147_v55, %v145_v48  ;;  %v150_v1 = vadd.f32 %v148_v57, %v146_v52 }
 0x10d   :  { %v98_v45 = vsel %vm97_vm3, %v94_v38, %v96_v36  ;;  %v99_v49 = vsel %vm97_vm3, %v96_v36, %v94_v38 }
 0x10e   :  { %v111_v56 = vmul.f32 %v104_v43, %v98_v45  ;;  %v112_v58 = vmul.f32 %v108_v44, %v99_v49 }
 0x110   :  { %v116_v46 = vpop.permute.xlu1 %115  ;;  %v114_v47 = vpop.permute.xlu0 %113 }
 0x111   :  { %v118_v50 = vsel %vm117_vm2, %v114_v47, %v116_v46  ;;  %v119_v51 = vsel %vm117_vm2, %v116_v46, %v114_v47 }
 0x112   :  { %v131_v53 = vmul.f32 %v124_v39, %v119_v51  ;;  %v132_v54 = vmul.f32 %v128_v40, %v118_v50 }
 0x114   :  { %v154_v59 = vpop.permute.xlu1 %153  ;;  %v152_v60 = vpop.permute.xlu0 %151  ;;  %v133_v62 = vsub.f32 %v111_v56, %v131_v53  ;;  %v134_v2 = vsub.f32 %v112_v58, %v132_v54 }
 0x115   :  { %v155_v63 = vsel %vm97_vm3, %v152_v60, %v154_v59  ;;  %v156_v0 = vsel %vm97_vm3, %v154_v59, %v152_v60 }
 0x116   :  { %v157_v3 = vmul.f32 %v155_v63, %v104_v43  ;;  %v158_v5 = vmul.f32 %v156_v0, %v108_v44  ;;  %v135_v8 = vand.u32 2147483647, %v133_v62  ;;  %v136_v9 = vand.u32 2147483647, %v134_v2 }
 0x118   :  { %v159_v6 = vadd.f32 %v157_v3, %v149_v61  ;;  %v160_v7 = vadd.f32 %v158_v5, %v150_v1 }
 0x11a   :  { %v161_v10 = vand.u32 2147483647, %v159_v6  ;;  %v162_v11 = vand.u32 2147483647, %v160_v7 }
 0x11c   :  { %v163_v12 = vadd.f32 %v161_v10, %v135_v8  ;;  %v164_v13 = vadd.f32 %v162_v11, %v136_v9 }
 0x11e   :  { %165 = vst [vmem:[#allocation7] sm:$0xff] %v163_v12  ;;  %166 = vst [vmem:[#allocation7 + $0x8] sm:$0xff] %v164_v13 }
 0x11f   :  { %241 = shalt.err (!%p238_p0)
}
 0x120   :  { %176 = dma.vmem_to_hbm [thread:$0]  %s174_s22, 256, %s311_s2, [#allocation4]  }
 0x121   :  { %254 = dma.done.wait [#allocation4], 256  }
 0x122   :  { %255 = vsyncadd [#allocation4], 4294967040 }
 0x123   :  { %180 = vsyncpa [#allocation3], 1 }
 0x124   :  { %181 = vsyncpa [#allocation6], 1 }
 0x125   :  { %182 = vsyncpa [#allocation4], 1 }

</bundles_post_ra>
